<compile_context>
chip_gen: v7x
topology: tpu7x:2x2x1
jax: 0.10.0
libtpu: 0.0.40
codegen_flags: <defaults>
</compile_context>

<pallas_src>
import jax
import jax.numpy as jnp
from jax.experimental import pallas as pl
from jax.experimental.pallas import tpu as pltpu


def _round_up(x, m):
    return ((x + m - 1) // m) * m


def _round_down(x, m):
    return (x // m) * m


def _drop_path_kernel(x_ref, s_ref, o_ref):
    # x_ref / o_ref: (tb, tf) tile of the flattened (B, F) tensor.
    # s_ref: (tb, 1) per-sample scale (0 or 1/keep_prob), broadcast over lanes.
    o_ref[...] = x_ref[...] * s_ref[...]


def drop_path_forward(x, drop_prob=0.0, training=False, *, rng_key=None,
                      target_block_bytes=4 << 20):
    """Pallas equivalent of basicsr `drop_path(x, drop_prob, training)`."""
    if drop_prob == 0.0 or not training:
        return x                        # identity path, exactly as in PyTorch
    if not (0.0 < drop_prob < 1.0):
        raise ValueError("drop_prob must be in (0, 1) on the stochastic path")
    keep_prob = 1.0 - drop_prob

    if rng_key is None:
        rng_key = jax.random.PRNGKey(0)

    orig_shape = x.shape
    B = int(orig_shape[0])
    F = 1
    for d in orig_shape[1:]:
        F *= int(d)
    F = max(F, 1)
    x2d = x.reshape(B, F)               # free reshape; no pad / slice copies

    # Per-sample keep mask hoisted out of the kernel: floor(keep_prob + U[0,1))
    # in {0,1}  <=>  Bernoulli(keep_prob). Scale cast once to x.dtype.
    keep = jax.random.bernoulli(rng_key, p=keep_prob, shape=(B, 1))
    scale = (keep.astype(jnp.float32) * (1.0 / keep_prob)).astype(x.dtype)

    # ---- block sizing by VMEM budget (dtype-aware sublane rounding) ----
    itemsize = jnp.dtype(x.dtype).itemsize
    sub = {4: 8, 2: 16, 1: 32}.get(itemsize, 8)
    lane = 128

    tb = min(_round_up(B, sub), 256)
    f_ceil = _round_up(F, lane)
    tf = _round_down(max(target_block_bytes // (tb * itemsize), lane), lane)
    tf = max(lane, min(tf, f_ceil))

    # Keep >= 2 blocks along one "parallel" axis (v7x has 2 TensorCores).
    if pl.cdiv(B, tb) == 1 and tf >= F and F > lane:
        tf = max(lane, _round_up(pl.cdiv(F, 2), lane))

    grid = (pl.cdiv(B, tb), pl.cdiv(F, tf))

    out = pl.pallas_call(
        _drop_path_kernel,
        out_shape=jax.ShapeDtypeStruct((B, F), x.dtype),
        grid_spec=pltpu.PrefetchScalarGridSpec(
            num_scalar_prefetch=0,
            grid=grid,
            in_specs=[
                pl.BlockSpec((tb, tf), lambda i, j: (i, j)),   # x tile
                pl.BlockSpec((tb, 1), lambda i, j: (i, 0)),    # per-sample scale
            ],
            out_specs=pl.BlockSpec((tb, tf), lambda i, j: (i, j)),
        ),
        input_output_aliases={0: 0},     # donate x's HBM buffer when possible
        compiler_params=pltpu.CompilerParams(
            dimension_semantics=("parallel", "parallel"),
            vmem_limit_bytes=32 << 20),
    )(x2d, scale)

    return out.reshape(orig_shape)


def _check_drop_path(x, drop_prob, rng_key, atol=1e-5):
    keep_prob = 1.0 - drop_prob
    y = drop_path_forward(x, drop_prob=drop_prob, training=True, rng_key=rng_key)
    y = jax.block_until_ready(y)
    B = x.shape[0]
    xf = x.reshape(B, -1)
    yf = y.reshape(B, -1)
    zeroed = jnp.all(yf == 0.0, axis=1)
    scaled = jnp.all(jnp.abs(yf - xf * (1.0 / keep_prob)) <= atol, axis=1)
    assert bool(jnp.all(zeroed | scaled)), \
        "each sample must be either fully dropped or scaled by 1/keep_prob"
    return y


if __name__ == "__main__":
    key = jax.random.PRNGKey(0)
    k_data, k_data2, k_mask, k_mask2 = jax.random.split(key, 4)

    drop_prob = 0.25

    # Main example: (B, C, H, W) = (2, 4, 16, 16), F = 1024 (lane-aligned).
    x = jax.random.normal(k_data, (2, 4, 16, 16), jnp.float32)
    _check_drop_path(x, drop_prob, k_mask)

    # Ragged shape: exercises partial (masked) last blocks in both grid dims.
    x_ragged = jax.random.normal(k_data2, (3, 5, 7, 9), jnp.float32)
    _check_drop_path(x_ragged, drop_prob, k_mask2)

    # Eval / p=0 paths are the identity, matching the PyTorch module.
    y_eval = drop_path_forward(x, drop_prob=drop_prob, training=False)
    assert jnp.array_equal(y_eval, x)
    y_p0 = drop_path_forward(x, drop_prob=0.0, training=True)
    assert jnp.array_equal(y_p0, x)

    print("KERNEL_OK")
</pallas_src>

<mosaic_0001>
module attributes {stable_mosaic.version = 11 : i64} {
  func.func @_drop_path_kernel(%arg0: i32, %arg1: i32, %arg2: memref<8x512xf32, #tpu.memory_space<vmem>>, %arg3: memref<8x1xf32, #tpu.memory_space<vmem>>, %arg4: memref<8x512xf32, #tpu.memory_space<vmem>>) attributes {dimension_semantics = [#tpu.dimension_semantics<parallel>, #tpu.dimension_semantics<parallel>], iteration_bounds = array<i64: 1, 2>, scalar_prefetch = 0 : i64, scratch_operands = 0 : i64, tpu.core_type = #tpu.core_type<tc>, window_params = [{transform_indices = @transform_0, window_bounds = array<i64: 8, 512>}, {transform_indices = @transform_1, window_bounds = array<i64: 8, 1>}, {transform_indices = @transform_2, window_bounds = array<i64: 8, 512>}]} {
    %c0 = arith.constant 0 : index
    %c0_0 = arith.constant 0 : index
    %0 = vector.load %arg2[%c0, %c0_0] : memref<8x512xf32, #tpu.memory_space<vmem>>, vector<8x512xf32>
    %c0_1 = arith.constant 0 : index
    %c0_2 = arith.constant 0 : index
    %1 = vector.load %arg3[%c0_1, %c0_2] : memref<8x1xf32, #tpu.memory_space<vmem>>, vector<8x1xf32>
    %2 = vector.broadcast %1 : vector<8x1xf32> to vector<8x512xf32>
    %3 = arith.mulf %0, %2 : vector<8x512xf32>
    %c0_3 = arith.constant 0 : index
    %c0_4 = arith.constant 0 : index
    %4 = vector.load %arg4[%c0_3, %c0_4] : memref<8x512xf32, #tpu.memory_space<vmem>>, vector<8x512xf32>
    tpu.vector_store %arg4[%c0_3, %c0_4], %3 {strides = array<i32>} : memref<8x512xf32, #tpu.memory_space<vmem>>, vector<8x512xf32>,
    return
  }
  func.func @transform_0(%arg0: i32, %arg1: i32) -> (i32, i32) {
    %c0_i32 = arith.constant 0 : i32
    return %arg0, %arg1 : i32, i32
  }
  func.func @transform_1(%arg0: i32, %arg1: i32) -> (i32, i32) {
    %c0_i32 = arith.constant 0 : i32
    %c0_i32_0 = arith.constant 0 : i32
    return %arg0, %c0_i32 : i32, i32
  }
  func.func @transform_2(%arg0: i32, %arg1: i32) -> (i32, i32) {
    %c0_i32 = arith.constant 0 : i32
    return %arg0, %arg1 : i32, i32
  }
}

</mosaic_0001>

<bundles_post_ra>
// kernel: tpu_custom_call.1
= control target key start
LH: loop header
LB: loop body
LE: loop exit
PB: predicated region body
PF: predicated region fallthrough
CT: control target
= control target key end

     0   :  { %7 = vsyncpa [#allocation3], 0  ;;  %s778_s0 = inlined_call_operand.hbm [shape: f32[2,1024], index: 0, kind: input, shape index: {}, may-alias: {0,2}]   ;;  %s779_s1 = inlined_call_operand.vmem [shape: f32[2,1], index: 1, kind: input, shape index: {}]   ;;  %s780_s2 = inlined_call_operand.hbm [shape: f32[2,1024], index: 2, kind: output, shape index: {}, may-alias: {0,2}]  }
   0x1   :  { %9 = vsyncpa [#allocation3 + $0x1], 0 }
   0x2   :  { %10 = vsyncpa [#allocation4], 0 }
   0x3   :  { %12 = vsyncpa [#allocation4 + $0x1], 0  ;;  %s618_s9 = smov 0   ;;  %s620_s10 = smov 0  }
   0x4   :  { %s622_s11 = smov 0   ;;  %s624_s12 = smov 0  }
   0x5   :  { %s626_s13 = smov 0   ;;  %s628_s14 = smov 0  }
   0x6 LB: > { %s401_s15 = sadd.s32 4294967295, %s588_s14   ;;  %s402_s16 = sadd.s32 4294967294, %s588_s14   ;;  %s588_s14 = sphi %s628_s14, %s18_s14   ;;  %s584_s13 = sphi %s626_s13, %s791_s13   ;;  %s580_s12 = sphi %s624_s12, %s790_s12   ;;  %s576_s11 = sphi %s622_s11, %s789_s11   ;;  %s572_s10 = sphi %s620_s10, %s788_s10   ;;  %s568_s9 = sphi %s618_s9, %s787_s9  }
   0x7   : > { %s27_s17 = sadd.s32 1, %s584_s13  ;;  %s39_s18 = sadd.s32 1, %s576_s11 }
   0x8   : > { %p28_p0 = scmp.ge.s32.totalorder %s27_s17, 2  ;;  %p46_p1 = scmp.ne.s32.totalorder %s576_s11, %s572_s10 }
   0x9   : > { %p47_p2 = scmp.eq.s32.totalorder %s588_s14, 0  ;;  %p52_p3 = scmp.ne.s32.totalorder %s572_s10, %s568_s9 }
   0xa   : > { %s793_s17 = smov (%p28_p0, %s27_s17), 0  ;;  %p53_p5 = scmp.eq.s32.totalorder %s401_s15, 0 }
   0xb   : > { %p48_p4 = por %p47_p2, %p46_p1  ;;  %s35_s19 = ssub.s32 %s584_s13, %s793_s17 }
   0xc   : > { %p104_p6 = scmp.eq.s32.totalorder %s401_s15, 1  ;;  %p37_p7 = scmp.eq.s32.totalorder %s35_s19, 0 }
   0xd   : > { %p661_p8 = por %p53_p5, %p52_p3  ;;  %p110_p10 = scmp.eq.s32.totalorder %s402_s16, 1 }
   0xe   : > { %p665_p9 = por %p104_p6, %p46_p1  ;;  %p781_p12 = scmp.ge.s32.totalorder %s588_s14, 2 }
   0xf   : > { %s670_s22 = scalar_select %p37_p7, %s576_s11, %s39_s18  }
  0x10   : > { %p672_p11 = por %p110_p10, %p52_p3  ;;  %139 = sbr.rel (%p781_p12) target bundleno = 55 (0x37), region = 20 }
  0x12   : > { %s784_s23 = scalar_select %p672_p11, 1, 0 }
  0x17   : > { %142 = sbr.rel (!%p48_p4) target bundleno = 55 (0x37), region = 24  ;;  %s143_s24 = sand.u32 (%p48_p4), 1, %s576_s11  }
  0x18   : > { %s406_s25 = sshll.u32 (%p48_p4), %s143_s24, 5  ;;  %s680_s26 = scalar_lea.sflag (%p48_p4), [#allocation3], %s143_s24 }
  0x19   : > { %s147_s27 = scalar_lea.vmem (%p48_p4), [#allocation2], %s406_s25 }
  0x1e   : > { %155 = vsyncadd %s680_s26, 384  ;;  %s417_s28 = sshll.u32 %s584_s13, 7  ;;  %s162_s29 = sshll.u32 %s147_s27, 4  ;;  %s689_s29 = int_to_ptr.vmem [resolvable:$true] %s162_s29 }
  0x1f   : > { %s687_s4 = scalar_lea.hbm %s778_s0, %s417_s28  ;;  %s488_s8 = scalar_lea.hbm %s778_s0, 256 }
  0x20   : > { %s486_s5 = scalar_lea.hbm %s687_s4, 128  ;;  %p489_p0 = scmp.lt.u32.totalorder %s687_s4, %s778_s0 }
  0x21   : > { %p487_p13 = scmp.ne.s32.totalorder %s687_s4, %s486_s5  ;;  %p490_p1 = scmp.lt.u32.totalorder %s488_s8, %s486_s5 }
  0x22   : > { %p492_p3 = scmp.lt.u32.totalorder %s486_s5, %s687_s4 }
  0x23   : > { %p491_p2 = por %p490_p1, %p489_p0 }
  0x25   : > { %p493_p4 = por %p492_p3, %p491_p2 }
  0x27   : > { %p494_p5 = pnand %p493_p4, %p487_p13 }
  0x29   : > { %497 = shalt.err (!%p494_p5)
}
  0x2a   : > { %s498_s18 = scalar_lea.vmem %s689_s29, 128  ;;  %s590_s19 = smov [#allocation2]  }
  0x2b   : > { %p499_p6 = scmp.ne.s32.totalorder %s689_s29, %s498_s18  ;;  %s500_s24 = sshll.u32 %s590_s19, 4  ;;  %s501_s24 = int_to_ptr.vmem [resolvable:$false] %s500_s24 }
  0x2c   : > { %s502_s25 = scalar_lea.vmem %s501_s24, 1024  ;;  %p503_p7 = scmp.lt.s32.totalorder %s689_s29, %s501_s24 }
  0x2d   : > { %p504_p10 = scmp.lt.s32.totalorder %s502_s25, %s498_s18 }
  0x2f   : > { %p505_p12 = por %p504_p10, %p503_p7 }
  0x31   : > { %p506_p11 = pnand %p505_p12, %p499_p6 }
  0x33   : > { %509 = shalt.err (!%p506_p11)
}
  0x34   : > { %s591_s27 = smov 256   ;;  %s592_s28 = smov 128  }
  0x35   : > { %s593_s30 = smov 8  }
  0x36   : > { %168 = dma.hbm_to_vmem [thread:$0]  %s687_s4, 128, %s689_s29, %s680_s26, %s591_s27, %s592_s28, %s593_s30  }
  0x37 PF: > { %p409_p13 = scmp.ge.s32.totalorder %s588_s14, 1  ;;  %p170_p0 = scmp.lt.s32.totalorder %s588_s14, 3 }
  0x39   : > { %p171_p1 = pnand %p409_p13, %p170_p0 }
  0x3a   : > { %s710_s3 = sand.u32 (!%p171_p1), 1, %s572_s10  }
  0x3b   : > { %174 = sbr.rel (%p171_p1) target bundleno = 229 (0xe5), region = 28  ;;  %s410_s5 = sshll.u32 (!%p171_p1), %s710_s3, 5 }
  0x3c   : > { %s177_s6 = scalar_lea.sflag (!%p171_p1), [#allocation3], %s710_s3  ;;  %s180_s7 = scalar_lea.vmem (!%p171_p1), [#allocation2], %s410_s5 }
  0x42   : > { %559 = dma.done.wait (%p661_p8), %s177_s6, 512  }
  0x43   : > { %561 = vsyncadd (%p661_p8), %s177_s6, 4294966784  ;;  %v594_v0 = vmov 0   ;;  %v232_v1 = vld [vmem:[%s779_s1] sm:$0xff]  ;;  %v240_v2 = vlaneseq  ;;  %v595_v3 = vmov 269488144   ;;  %v229_v22 = vld [vmem:[%s180_s7 + $0x8] sm:$0xff] }
  0x44   : > { %485 = vset.pattern.permute.xlu0 %v594_v0  ;;  %v238_v4 = vunpack.c.l.s4 %v595_v3  ;;  %v596_v5 = vmov 842150450   ;;  %v597_v7 = vmov 1414812756   ;;  %v598_v9 = vmov 1987475062  }
  0x45   : > { %235 = vperm.xlu0 %485, %v232_v1   ;;  %v245_v6 = vunpack.c.l.s4 %v596_v5  ;;  %v252_v8 = vunpack.c.l.s4 %v597_v7  ;;  %v259_v10 = vunpack.c.l.s4 %v598_v9  ;;  %v241_v11 = vshrl.u32 %v240_v2, 7  ;;  %v228_v20 = vld [vmem:[%s180_s7] sm:$0xff]  ;;  %v230_v23 = vld [vmem:[%s180_s7 + $0x10] sm:$0xff]  ;;  %v231_v24 = vld [vmem:[%s180_s7 + $0x18] sm:$0xff]  ;;  %s207_s20 = scalar_lea.vmem [#allocation5], %s410_s5  ;;  %s278_s4 = scalar_lea.sflag [#allocation4], %s710_s3 }
  0x46   : > { %v239_v12 = vunpack.c.0.s8 %v238_v4 }
  0x47   : > { %v246_v13 = vunpack.c.0.s8 %v245_v6  ;;  %v253_v14 = vunpack.c.0.s8 %v252_v8  ;;  %v260_v15 = vunpack.c.0.s8 %v259_v10 }
  0x48   : > { %v242_v16 = vsub.s32 %v239_v12, %v241_v11 }
  0x49   : > { %v249_v17 = vsub.s32 %v246_v13, %v241_v11  ;;  %v256_v18 = vsub.s32 %v253_v14, %v241_v11  ;;  %v263_v19 = vsub.s32 %v260_v15, %v241_v11 }
  0xc4   : > { %v236_v21 = vpop.permute.xlu0 %235  ;;  %284 = sbr.rel (!%p665_p9) target bundleno = 229 (0xe5), region = 36 }
  0xc5   : > { %v243_v25 = vrot.slane %v236_v21, %v242_v16  ;;  %v250_v26 = vrot.slane %v236_v21, %v249_v17  ;;  %v257_v27 = vrot.slane %v236_v21, %v256_v18  ;;  %v264_v28 = vrot.slane %v236_v21, %v263_v19 }
  0xc7   : > { %v269_v29 = vmul.f32 %v243_v25, %v228_v20  ;;  %v270_v30 = vmul.f32 %v250_v26, %v229_v22  ;;  %v271_v31 = vmul.f32 %v257_v27, %v230_v23  ;;  %v272_v32 = vmul.f32 %v264_v28, %v231_v24 }
  0xc9   : > { %273 = vst [vmem:[%s207_s20] sm:$0xff] %v269_v29  ;;  %274 = vst [vmem:[%s207_s20 + $0x8] sm:$0xff] %v270_v30 }
  0xca   : > { %275 = vst [vmem:[%s207_s20 + $0x10] sm:$0xff] %v271_v31  ;;  %276 = vst [vmem:[%s207_s20 + $0x18] sm:$0xff] %v272_v32 }
  0xcb   : > { %292 = vsyncadd %s278_s4, 384  ;;  %s418_s8 = sshll.u32 %s580_s12, 7  ;;  %s299_s15 = sshll.u32 %s207_s20, 4  ;;  %s736_s15 = int_to_ptr.vmem [resolvable:$true] %s299_s15 }
  0xcc   : > { %s734_s19 = scalar_lea.hbm %s780_s2, %s418_s8  ;;  %s510_s24 = scalar_lea.vmem %s736_s15, 128 }
  0xcd   : > { %p511_p8 = scmp.ne.s32.totalorder %s736_s15, %s510_s24  ;;  %s599_s21 = smov [#allocation5]  }
  0xce   : > { %s512_s25 = sshll.u32 %s599_s21, 4  ;;  %s513_s25 = int_to_ptr.vmem [resolvable:$false] %s512_s25 }
  0xcf   : > { %s514_s27 = scalar_lea.vmem %s513_s25, 1024  ;;  %p515_p9 = scmp.lt.s32.totalorder %s736_s15, %s513_s25 }
  0xd0   : > { %p516_p11 = scmp.lt.s32.totalorder %s514_s27, %s510_s24 }
  0xd2   : > { %p517_p12 = por %p516_p11, %p515_p9 }
  0xd4   : > { %p518_p2 = pnand %p517_p12, %p511_p8 }
  0xd6   : > { %521 = shalt.err (!%p518_p2)
}
  0xd7   : > { %s522_s12 = scalar_lea.hbm %s734_s19, 128  ;;  %s524_s5 = scalar_lea.hbm %s780_s2, 256 }
  0xd8   : > { %p523_p3 = scmp.ne.s32.totalorder %s734_s19, %s522_s12  ;;  %p525_p4 = scmp.lt.u32.totalorder %s734_s19, %s780_s2 }
  0xd9   : > { %p526_p5 = scmp.lt.u32.totalorder %s524_s5, %s522_s12  ;;  %p528_p7 = scmp.lt.u32.totalorder %s522_s12, %s734_s19 }
  0xdb   : > { %p527_p6 = por %p526_p5, %p525_p4 }
  0xdd   : > { %p529_p10 = por %p528_p7, %p527_p6 }
  0xdf   : > { %p530_p13 = pnand %p529_p10, %p523_p3 }
  0xe1   : > { %533 = shalt.err (!%p530_p13)
}
  0xe2   : > { %s600_s26 = smov 128   ;;  %s601_s29 = smov 256  }
  0xe3   : > { %s602_s20 = smov 8  }
  0xe4   : > { %305 = dma.vmem_to_hbm [thread:$0]  %s736_s15, 128, %s734_s19, %s278_s4, %s600_s26, %s601_s29, %s602_s20  }
  0xe5 PF: > { %s314_s8 = sand.u32 1, %s568_s9   ;;  %p785_p0 = scmp.ne.s32.totalorder %s784_s23, 0 }
  0xe6   : > { %p786_p1 = scmp.ge.s32.totalorder %s588_s14, 2  ;;  %s315_s16 = scalar_lea.sflag [#allocation4], %s314_s8 }
  0xe8   : > { %p422_p8 = pnand %p786_p1, %p785_p0 }
  0xea   : > { %563 = dma.done.wait (!%p422_p8), %s315_s16, 512  }
  0xeb   : > { %565 = vsyncadd (!%p422_p8), %s315_s16, 4294966784  ;;  %s18_s14 = sadd.s32 1, %s588_s14   ;;  %s787_s9 = smov %s572_s10 }
  0xec   : > { %p15_p9 = scmp.ge.s32.totalorder %s18_s14, 4   ;;  %s788_s10 = smov %s576_s11 }
  0xed   : > { %s789_s11 = smov %s670_s22  ;;  %s790_s12 = smov %s584_s13 }
  0xee   : > { %s791_s13 = smov %s793_s17  ;;  %17 = sbr.rel (!%p15_p9) target bundleno = 6 (0x6), region = 76 }
  0xf5   :  { %320 = vsyncpa [#allocation3], 1 }
  0xf6   :  { %322 = vsyncpa [#allocation3 + $0x1], 1 }
  0xf7   :  { %323 = vsyncpa [#allocation4], 1 }
  0xf8   :  { %325 = vsyncpa [#allocation4 + $0x1], 1 }

</bundles_post_ra>
